<compile_context>
chip_gen: v7x
topology: tpu7x:2x2x1
jax: 0.10.0
libtpu: 0.0.40
codegen_flags: <defaults>
</compile_context>

<pallas_src>
import functools

import numpy as np

import jax
import jax.numpy as jnp
from jax.experimental import pallas as pl
from jax.experimental.pallas import tpu as pltpu


# -----------------------------------------------------------------------------
# One-time self-calibration of pltpu.roll's rotate direction.
# Returns (lane_fwd, sub_fwd): True  -> roll(x, size-1, axis)[i] == x[i+1]
#                              False -> roll(x, 1,      axis)[i] == x[i+1]
# -----------------------------------------------------------------------------
@functools.lru_cache(maxsize=None)
def _roll_dirs():
    def probe(x_ref, lane_ref, sub_ref):
        lane_ref[...] = pltpu.roll(x_ref[...], 127, axis=1)
        sub_ref[...] = pltpu.roll(x_ref[...], 7, axis=0)

    r = jax.lax.broadcasted_iota(jnp.float32, (8, 128), 0)
    c = jax.lax.broadcasted_iota(jnp.float32, (8, 128), 1)
    x = r * 128.0 + c
    lane, sub = pl.pallas_call(
        probe,
        out_shape=(jax.ShapeDtypeStruct((8, 128), jnp.float32),
                   jax.ShapeDtypeStruct((8, 128), jnp.float32)),
    )(x)
    lane_fwd = int(lane[0, 0]) == 1      # picked x[0, 1]  -> np.roll convention
    sub_fwd = int(sub[0, 0]) == 128      # picked x[1, 0]  -> np.roll convention
    return lane_fwd, sub_fwd


# -----------------------------------------------------------------------------
# Fused kernel (one batch tile of TILE_B samples per grid step)
# -----------------------------------------------------------------------------
def _lenet_kernel(x0_ref, t1_ref, b1_ref, t2_ref, b2_ref,
                  wfc1_ref, bfc1_ref, wfc2_ref, bfc2_ref, wfc3_ref, bfc3_ref,
                  rep_ref, out_ref, s_ref, *, tile_b, lane_fwd, sub_fwd):
    f32, bf16 = jnp.float32, jnp.bfloat16
    TR = tile_b * 32          # rows: row = b_local*32 + h
    PAD = 8                   # zero rows so shifted reads stay in bounds
    LANES = 256

    # roll shifts that select the "+1 lane" / "+1 row" / "+2 row" neighbour
    lshift = (LANES - 1) if lane_fwd else 1
    rshift1 = (TR - 1) if sub_fwd else 1
    rshift2 = (TR - 2) if sub_fwd else 2

    # ------------- conv1 (3->6, 5x5 valid) + bias + ReLU ---------------------
    # y1[b*32+oh, co*28+ow]; input lane = ci*32 + w (bf16), f32 accumulate.
    acc = jnp.dot(x0_ref[pl.ds(0, TR), :], t1_ref[0],
                  preferred_element_type=f32) + b1_ref[...]
    for i in range(1, 5):                                    # KH shifts
        acc = acc + jnp.dot(x0_ref[pl.ds(i, TR), :], t1_ref[i],
                            preferred_element_type=f32)
    y1 = jnp.maximum(acc, 0.0)                               # (TR, 256) f32

    # ------------- maxpool 2x2 (stage 1) — XLU rolls, no scratch round trip --
    pw = jnp.maximum(y1, pltpu.roll(y1, lshift, axis=1))     # W neighbour
    a1 = jnp.maximum(pw, pltpu.roll(pw, rshift1, axis=0))    # H neighbour
    # pooled1(b,c,h2,w2) == a1[b*32 + 2*h2, c*28 + 2*w2]  (kept strided)
    s_ref[pl.ds(0, TR), :] = a1.astype(bf16)
    s_ref[pl.ds(TR, PAD), :] = jnp.zeros((PAD, LANES), bf16)

    # ------------- conv2 (6->16, 5x5 valid on pooled grid) -------------------
    acc2 = jnp.dot(s_ref[pl.ds(0, TR), :], t2_ref[0],
                   preferred_element_type=f32) + b2_ref[...]
    for i in range(1, 5):                                    # KH shifts, stride 2 rows
        acc2 = acc2 + jnp.dot(s_ref[pl.ds(2 * i, TR), :], t2_ref[i],
                              preferred_element_type=f32)
    y2 = jnp.maximum(acc2, 0.0)                              # lanes: co2*10 + ow

    # ------------- maxpool 2x2 (stage 2) -------------------------------------
    pw2 = jnp.maximum(y2, pltpu.roll(y2, lshift, axis=1))
    a2 = jnp.maximum(pw2, pltpu.roll(pw2, rshift2, axis=0))
    # pooled2(b,c,h5,w5) == a2[b*32 + 4*h5, c*10 + 2*w5]
    s_ref[pl.ds(0, TR), :] = a2.astype(bf16)

    # ------------- fc1: 5 sublane-strided matmuls (rows b*32 + 4*h5) ---------
    # wfc1[h5] is nonzero only at rows c*10 + 2*w5, so garbage lanes vanish.
    h1 = jnp.dot(s_ref[pl.ds(0, tile_b, stride=32), :], wfc1_ref[0],
                 preferred_element_type=f32) + bfc1_ref[...]
    for h5 in range(1, 5):
        h1 = h1 + jnp.dot(s_ref[pl.ds(4 * h5, tile_b, stride=32), :],
                          wfc1_ref[h5], preferred_element_type=f32)
    h1 = jnp.maximum(h1, 0.0).astype(bf16)                   # (tile_b, 128)

    # ------------- fc2 -> fc3 (padded to 128 lanes, lane-dense stores) -------
    h2 = jnp.maximum(
        jnp.dot(h1, wfc2_ref[...], preferred_element_type=f32) + bfc2_ref[...],
        0.0)
    rep_ref[...] = h2                                        # relu(fc2), f32
    out_ref[...] = (jnp.dot(h2.astype(bf16), wfc3_ref[...],
                            preferred_element_type=f32) + bfc3_ref[...])


# -----------------------------------------------------------------------------
# Parameters (PyTorch layout) and one-time MXU-friendly packing
# -----------------------------------------------------------------------------
def init_lenet_params(key, num_classes):
    """Parameters in PyTorch layout: conv (Cout,Cin,KH,KW), linear (out,in)."""
    ks = jax.random.split(key, 10)
    s = 0.05
    return {
        "conv1_w": s * jax.random.normal(ks[0], (6, 3, 5, 5), jnp.float32),
        "conv1_b": s * jax.random.normal(ks[1], (6,), jnp.float32),
        "conv2_w": s * jax.random.normal(ks[2], (16, 6, 5, 5), jnp.float32),
        "conv2_b": s * jax.random.normal(ks[3], (16,), jnp.float32),
        "fc1_w": s * jax.random.normal(ks[4], (120, 16 * 5 * 5), jnp.float32),
        "fc1_b": s * jax.random.normal(ks[5], (120,), jnp.float32),
        "fc2_w": s * jax.random.normal(ks[6], (84, 120), jnp.float32),
        "fc2_b": s * jax.random.normal(ks[7], (84,), jnp.float32),
        "fc3_w": s * jax.random.normal(ks[8], (num_classes, 84), jnp.float32),
        "fc3_b": s * jax.random.normal(ks[9], (num_classes,), jnp.float32),
    }


def pack_lenet_params(params):
    """Toeplitz-pack convs, permute/pad fc weights; weights bf16, biases f32."""
    _roll_dirs()  # prime the roll-direction probe (one tiny device call)
    f32, bf16 = np.float32, jnp.bfloat16
    num_classes = params["fc3_w"].shape[0]
    assert num_classes <= 128, "fc3 output must fit in one 128-lane tile"

    def conv_toeplitz(w, cin_lane_stride, in_spatial_stride, out_w,
                      lane_in, lane_out):
        w = np.asarray(w, f32)
        cout, cin, kh, kw = w.shape
        t = np.zeros((kh, lane_in, lane_out), f32)
        for co in range(cout):
            for ci in range(cin):
                for i in range(kh):
                    for j in range(kw):
                        for ow in range(out_w):
                            t[i, ci * cin_lane_stride + (ow + j) * in_spatial_stride,
                              co * out_w + ow] = w[co, ci, i, j]
        return jnp.asarray(t, bf16)

    def bias_lane(b, width, lane_out):
        v = np.zeros((1, lane_out), f32)
        b = np.asarray(b, f32)
        v[0, :b.shape[0] * width] = np.repeat(b, width)
        return jnp.asarray(v)                     # f32 (epilogue stays f32)

    def fc_pad(w, b, k_pad, n_pad):               # torch (out, in) layout
        w = np.asarray(w, f32)
        b = np.asarray(b, f32)
        out_dim, in_dim = w.shape
        wp = np.zeros((k_pad, n_pad), f32)
        wp[:in_dim, :out_dim] = w.T
        bp = np.zeros((1, n_pad), f32)
        bp[0, :out_dim] = b
        return jnp.asarray(wp, bf16), jnp.asarray(bp)

    # fc1: permute PyTorch's NCHW flatten order (c*25 + h*5 + w) onto the
    # in-kernel feature layout: group h5 (strided row read), row c*10 + 2*w5.
    fc1_w = np.asarray(params["fc1_w"], f32)      # (120, 400)
    wfc1 = np.zeros((5, 256, 128), f32)
    for n in range(120):
        for c in range(16):
            for h in range(5):
                for w in range(5):
                    wfc1[h, c * 10 + 2 * w, n] = fc1_w[n, c * 25 + h * 5 + w]
    bfc1 = np.zeros((1, 128), f32)
    bfc1[0, :120] = np.asarray(params["fc1_b"], f32)

    wfc2, bfc2 = fc_pad(params["fc2_w"], params["fc2_b"], 128, 128)
    wfc3, bfc3 = fc_pad(params["fc3_w"], params["fc3_b"], 128, 128)

    return {
        # conv1: input lane = ci*32 + w ; output lane = co*28 + ow
        "t1": conv_toeplitz(params["conv1_w"], 32, 1, 28, 128, 256),
        "b1": bias_lane(params["conv1_b"], 28, 256),
        # conv2: input lane = c*28 + 2*w2 (pooled, strided) ; out = co*10 + ow
        "t2": conv_toeplitz(params["conv2_w"], 28, 2, 10, 256, 256),
        "b2": bias_lane(params["conv2_b"], 10, 256),
        "wfc1": jnp.asarray(wfc1, bf16), "bfc1": jnp.asarray(bfc1),
        "wfc2": wfc2, "bfc2": bfc2,
        "wfc3": wfc3, "bfc3": bfc3,
    }


# -----------------------------------------------------------------------------
# Forward
# -----------------------------------------------------------------------------
def lenet_forward(packed, x, *, num_classes, tile_b=8):
    B = x.shape[0]
    assert x.shape[1:] == (3, 32, 32), "LeNet's 16*5*5 flatten needs 3x32x32 input"

    if B <= tile_b:
        tile_b = B                       # single tile: block dims == full dims
    else:
        assert tile_b % 8 == 0, "multi-tile runs need tile_b % 8 == 0"
    b_pad = -(-B // tile_b) * tile_b
    nt = b_pad // tile_b
    TR = tile_b * 32
    PAD = 8

    lane_fwd, sub_fwd = _roll_dirs()     # static bools (cached, no device work)

    # Tiny input repack (only XLA op besides the two output slices):
    # NCHW -> per-tile rows b_local*32 + h, lanes ci*32 + w, bf16, zero padded.
    x0 = x.astype(jnp.bfloat16).transpose(0, 2, 1, 3).reshape(B, 32, 96)
    x0 = jnp.pad(x0, ((0, b_pad - B), (0, 0), (0, 32)))       # (b_pad, 32, 128)
    x0 = x0.reshape(nt, TR, 128)
    x0 = jnp.pad(x0, ((0, 0), (0, PAD), (0, 0)))              # (nt, TR+8, 128)

    operands = (x0, packed["t1"], packed["b1"], packed["t2"], packed["b2"],
                packed["wfc1"], packed["bfc1"], packed["wfc2"], packed["bfc2"],
                packed["wfc3"], packed["bfc3"])

    def const_spec(shape):               # grid-invariant (weights / biases)
        nd = len(shape)
        return pl.BlockSpec(shape, lambda t, _nd=nd: (0,) * _nd)

    in_specs = [pl.BlockSpec((None, TR + PAD, 128), lambda t: (t, 0, 0))]
    in_specs += [const_spec(op.shape) for op in operands[1:]]

    rep_pad, out_pad = pl.pallas_call(
        functools.partial(_lenet_kernel, tile_b=tile_b,
                          lane_fwd=lane_fwd, sub_fwd=sub_fwd),
        out_shape=(jax.ShapeDtypeStruct((b_pad, 128), jnp.float32),
                   jax.ShapeDtypeStruct((b_pad, 128), jnp.float32)),
        grid=(nt,),
        in_specs=in_specs,
        out_specs=(pl.BlockSpec((tile_b, 128), lambda t: (t, 0)),
                   pl.BlockSpec((tile_b, 128), lambda t: (t, 0))),
        scratch_shapes=[
            pltpu.VMEM((TR + PAD, 256), jnp.bfloat16),   # pooled activations
        ],
        compiler_params=pltpu.CompilerParams(
            dimension_semantics=("parallel",)),          # megacore batch split
    )(*operands)

    return {"representation": rep_pad[:B, :84],
            "output": out_pad[:B, :num_classes]}


# -----------------------------------------------------------------------------
# Plain-JAX reference (numerical sanity check)
# -----------------------------------------------------------------------------
def lenet_reference(params, x):
    def conv_relu(h, w, b):
        y = jax.lax.conv_general_dilated(
            h, w, window_strides=(1, 1), padding="VALID",
            dimension_numbers=("NCHW", "OIHW", "NCHW"))
        return jax.nn.relu(y + b.reshape(1, -1, 1, 1))

    def pool(h):
        return jax.lax.reduce_window(h, -jnp.inf, jax.lax.max,
                                     (1, 1, 2, 2), (1, 1, 2, 2), "VALID")

    h = pool(conv_relu(x, params["conv1_w"], params["conv1_b"]))
    h = pool(conv_relu(h, params["conv2_w"], params["conv2_b"]))
    h = h.reshape(h.shape[0], -1)                        # NCHW flatten (c,h,w)
    h = jax.nn.relu(h @ params["fc1_w"].T + params["fc1_b"])
    rep = jax.nn.relu(h @ params["fc2_w"].T + params["fc2_b"])
    out = rep @ params["fc3_w"].T + params["fc3_b"]
    return {"representation": rep, "output": out}


# TODO(synk): the alternate `forward_reture_feature` / `level != 0` paths of
#             the PyTorch module are not implemented (default forward only).

# -----------------------------------------------------------------------------
if __name__ == "__main__":
    num_classes = 10
    batch = 2

    key = jax.random.PRNGKey(0)
    k_x, k_p = jax.random.split(key)
    x = jax.random.normal(k_x, (batch, 3, 32, 32), jnp.float32)
    params = init_lenet_params(k_p, num_classes)
    packed = pack_lenet_params(params)

    fwd = jax.jit(lenet_forward, static_argnames=("num_classes", "tile_b"))
    out = fwd(packed, x, num_classes=num_classes)
    jax.block_until_ready(out)

    assert out["representation"].shape == (batch, 84)
    assert out["output"].shape == (batch, num_classes)

    # Numerical sanity check vs. plain-JAX f32 reference (loose tol: bf16 MXU
    # operands with f32 accumulation; typical |err| observed is < 1e-2).
    ref = lenet_reference(params, x)
    np.testing.assert_allclose(np.asarray(out["output"]),
                               np.asarray(ref["output"]), rtol=2e-1, atol=3e-2)
    np.testing.assert_allclose(np.asarray(out["representation"]),
                               np.asarray(ref["representation"]),
                               rtol=2e-1, atol=3e-2)

    print("KERNEL_OK")
</pallas_src>

<mosaic_0001>
module attributes {stable_mosaic.version = 11 : i64} {
  func.func @probe(%arg0: memref<8x128xf32, #tpu.memory_space<vmem>>, %arg1: memref<8x128xf32, #tpu.memory_space<vmem>>, %arg2: memref<8x128xf32, #tpu.memory_space<vmem>>) attributes {dimension_semantics = [], scalar_prefetch = 0 : i64, scratch_operands = 0 : i64, tpu.core_type = #tpu.core_type<tc>} {
    %c0 = arith.constant 0 : index
    %c0_0 = arith.constant 0 : index
    %0 = vector.load %arg0[%c0, %c0_0] : memref<8x128xf32, #tpu.memory_space<vmem>>, vector<8x128xf32>
    %c127_i32 = arith.constant 127 : i32
    %1 = tpu.dynamic_rotate %0 by %c127_i32 dim 1 : vector<8x128xf32>, i32 -> vector<8x128xf32>
    %c0_1 = arith.constant 0 : index
    %c0_2 = arith.constant 0 : index
    %2 = vector.load %arg1[%c0_1, %c0_2] : memref<8x128xf32, #tpu.memory_space<vmem>>, vector<8x128xf32>
    tpu.vector_store %arg1[%c0_1, %c0_2], %1 {strides = array<i32>} : memref<8x128xf32, #tpu.memory_space<vmem>>, vector<8x128xf32>,
    %c0_3 = arith.constant 0 : index
    %c0_4 = arith.constant 0 : index
    %3 = vector.load %arg0[%c0_3, %c0_4] : memref<8x128xf32, #tpu.memory_space<vmem>>, vector<8x128xf32>
    %c7_i32 = arith.constant 7 : i32
    %4 = tpu.dynamic_rotate %3 by %c7_i32 dim 0 : vector<8x128xf32>, i32 -> vector<8x128xf32>
    %c0_5 = arith.constant 0 : index
    %c0_6 = arith.constant 0 : index
    %5 = vector.load %arg2[%c0_5, %c0_6] : memref<8x128xf32, #tpu.memory_space<vmem>>, vector<8x128xf32>
    tpu.vector_store %arg2[%c0_5, %c0_6], %4 {strides = array<i32>} : memref<8x128xf32, #tpu.memory_space<vmem>>, vector<8x128xf32>,
    return
  }
}

</mosaic_0001>

<bundles_post_ra>
// kernel: tpu_custom_call.1
= control target key start
LH: loop header
LB: loop body
LE: loop exit
PB: predicated region body
PF: predicated region fallthrough
CT: control target
= control target key end

     0   :  { %8 = vsyncpa [#allocation3], 0  ;;  %s191_s0 = inlined_call_operand.hbm [shape: f32[8,128], index: 0, kind: input, shape index: {}]   ;;  %s192_s1 = inlined_call_operand.hbm [shape: f32[8,128], index: 1, kind: output, shape index: {0}]   ;;  %s193_s2 = inlined_call_operand.hbm [shape: f32[8,128], index: 2, kind: output, shape index: {1}]  }
   0x1   :  { %9 = vsyncpa [#allocation4], 0 }
   0x2   :  { %10 = vsyncpa [#allocation7], 0  ;;  %s136_s9 = smov [#allocation2]   ;;  %s64_s13 = scalar_lea.hbm %s191_s0, 128 }
   0x3   :  { %s17_s10 = sshll.u32 %s136_s9, 4  ;;  %p65_p0 = scmp.ne.s32.totalorder %s191_s0, %s64_s13  ;;  %s18_s10 = int_to_ptr.vmem [resolvable:$true] %s17_s10 }
   0x4   :  { %p68_p1 = scmp.lt.u32.totalorder %s64_s13, %s191_s0 }
   0x6   :  { %p70_p2 = pnand %p68_p1, %p65_p0 }
   0x8   :  { %73 = shalt.err (!%p70_p2)
}
   0x9   :  { %s74_s18 = scalar_lea.vmem %s18_s10, 128  ;;  %p79_p4 = scmp.lt.s32.totalorder %s18_s10, %s18_s10 }
   0xa   :  { %p75_p3 = scmp.ne.s32.totalorder %s18_s10, %s74_s18  ;;  %p80_p5 = scmp.lt.s32.totalorder %s74_s18, %s74_s18 }
   0xc   :  { %p81_p6 = por %p80_p5, %p79_p4 }
   0xe   :  { %p82_p7 = pnand %p81_p6, %p75_p3 }
  0x10   :  { %85 = shalt.err (!%p82_p7)
}
  0x11   :  { %20 = dma.hbm_to_vmem [thread:$0]  %s191_s0, 128, %s18_s10, [#allocation3]  }
  0x12   :  { %130 = dma.done.wait [#allocation3], 128  }
  0x13   :  { %131 = vsyncadd [#allocation3], 4294967168  ;;  %s137_s21 = smov [#allocation6]   ;;  %v24_v0 = vld [vmem:[#allocation2] sm:$0xff]  ;;  %s138_s23 = smov 127  }
  0x14   :  { %s47_s22 = sshll.u32 %s137_s21, 4  ;;  %25 = vrot.lane.b32.xlu0 %v24_v0, %s138_s23  ;;  %v29_v1 = vrot.slane %v24_v0, 1  ;;  %s48_s22 = int_to_ptr.vmem [resolvable:$true] %s47_s22 }
  0x15   :  { %s86_s24 = scalar_lea.vmem %s48_s22, 128  ;;  %p91_p9 = scmp.lt.s32.totalorder %s48_s22, %s48_s22 }
  0x16   :  { %30 = vst [vmem:[#allocation6] sm:$0xff] %v29_v1  ;;  %p87_p8 = scmp.ne.s32.totalorder %s48_s22, %s86_s24  ;;  %p92_p10 = scmp.lt.s32.totalorder %s86_s24, %s86_s24 }
  0x18   :  { %p93_p11 = por %p92_p10, %p91_p9 }
  0x1a   :  { %p94_p12 = pnand %p93_p11, %p87_p8 }
  0x1c   :  { %97 = shalt.err (!%p94_p12)
}
  0x1d   :  { %s98_s0 = scalar_lea.hbm %s193_s2, 128 }
  0x1e   :  { %p99_p13 = scmp.ne.s32.totalorder %s193_s2, %s98_s0  ;;  %p102_p0 = scmp.lt.u32.totalorder %s98_s0, %s193_s2 }
  0x20   :  { %p104_p1 = pnand %p102_p0, %p99_p13 }
  0x22   :  { %107 = shalt.err (!%p104_p1)
}
  0x23   :  { %50 = dma.vmem_to_hbm [thread:$0]  %s48_s22, 128, %s193_s2, [#allocation7]  }
  0x24   :  { %s139_s5 = smov [#allocation5]  }
  0x25   :  { %s37_s6 = sshll.u32 %s139_s5, 4  ;;  %s38_s6 = int_to_ptr.vmem [resolvable:$true] %s37_s6 }
  0x26   :  { %s108_s7 = scalar_lea.vmem %s38_s6, 128  ;;  %p113_p3 = scmp.lt.s32.totalorder %s38_s6, %s38_s6 }
  0x27   :  { %p109_p2 = scmp.ne.s32.totalorder %s38_s6, %s108_s7  ;;  %p114_p4 = scmp.lt.s32.totalorder %s108_s7, %s108_s7 }
  0x29   :  { %p115_p5 = por %p114_p4, %p113_p3 }
  0x2b   :  { %p116_p6 = pnand %p115_p5, %p109_p2 }
  0x86   :  { %v26_v2 = vpop.permute.xlu0 %25 }
  0x87   :  { %27 = vst [vmem:[#allocation5] sm:$0xff] %v26_v2 }
  0x88   :  { %119 = shalt.err (!%p116_p6)
}
  0x89   :  { %s120_s10 = scalar_lea.hbm %s192_s1, 128 }
  0x8a   :  { %p121_p7 = scmp.ne.s32.totalorder %s192_s1, %s120_s10  ;;  %p124_p8 = scmp.lt.u32.totalorder %s120_s10, %s192_s1 }
  0x8c   :  { %p126_p9 = pnand %p124_p8, %p121_p7 }
  0x8e   :  { %129 = shalt.err (!%p126_p9)
}
  0x8f   :  { %40 = dma.vmem_to_hbm [thread:$0]  %s38_s6, 128, %s192_s1, [#allocation4]  }
  0x90   :  { %132 = dma.done.wait [#allocation4], 128  }
  0x91   :  { %133 = vsyncadd [#allocation4], 4294967168 }
  0x92   :  { %134 = dma.done.wait [#allocation7], 128  }
  0x93   :  { %135 = vsyncadd [#allocation7], 4294967168 }
  0x94   :  { %57 = vsyncpa [#allocation3], 1 }
  0x95   :  { %58 = vsyncpa [#allocation4], 1 }
  0x96   :  { %59 = vsyncpa [#allocation7], 1 }

</bundles_post_ra>
